<compile_context>
chip_gen: v7x
topology: tpu7x:2x2x1
jax: 0.10.0
libtpu: 0.0.40
codegen_flags: <defaults>
</compile_context>

<pallas_src>
import jax
import jax.numpy as jnp
from jax.experimental import pallas as pl
from jax.experimental.pallas import tpu as pltpu

# Hopper-v2 dimensions from the original script.
NS = 11            # observation dim
NA = 3             # action dim
H1 = 400           # fc1 out
H2 = 300           # fc2 out
OUT = 1            # critic output
DIS = 0.0003       # final-layer init range

# Lane-aligned (multiple-of-128) padded hidden dims.
H1P = 512
H2P = 384

DEFAULT_TM = 256   # batch tile (multiple of 8; 256 fills a 256-wide MXU push)


def critic_kernel(x_ref, a_ref, w1_ref, b1_ref, w2x_ref, w2a_ref, b2_ref,
                  w3_ref, b3_ref, out_ref):
    # fc1 + relu: bf16 MXU inputs, f32 accumulation, relu on the f32 acc.
    h1 = jnp.dot(x_ref[...], w1_ref[...], preferred_element_type=jnp.float32)
    h1 = jnp.maximum(h1 + b1_ref[...], 0.0)
    h1 = h1.astype(w2x_ref.dtype)                # back to bf16 for the next dot

    # fc2 on cat([h1, a], 1) + relu   (concat expressed as a split matmul).
    h2 = (jnp.dot(h1, w2x_ref[...], preferred_element_type=jnp.float32)
          + jnp.dot(a_ref[...], w2a_ref[...], preferred_element_type=jnp.float32))
    h2 = jnp.maximum(h2 + b2_ref[...], 0.0)      # f32, padded cols stay exactly 0

    # fc3 (N=1): VPU multiply + cross-lane reduce instead of a degenerate matmul.
    q = jnp.sum(h2 * w3_ref[...], axis=-1, keepdims=True) + b3_ref[...]
    out_ref[...] = q.astype(out_ref.dtype)


def prepare_params(params, dtype=jnp.bfloat16):
    """One-time re-layout: PyTorch [out,in] -> [in,out], split W2 at the concat
    boundary, zero-pad hidden dims to (H1P, H2P), cast matmul weights to bf16.
    Biases and the fc3 row stay f32 (accuracy, negligible bytes)."""
    w1, b1, w2, b2, w3, b3 = params                     # PyTorch layout
    w1t = jnp.zeros((NS, H1P), dtype).at[:, :H1].set(w1.T.astype(dtype))
    w2t = w2.T                                          # [H1+NA, H2]
    w2x = jnp.zeros((H1P, H2P), dtype).at[:H1, :H2].set(w2t[:H1, :].astype(dtype))
    w2a = jnp.zeros((NA, H2P), dtype).at[:, :H2].set(w2t[H1:, :].astype(dtype))
    b1p = jnp.zeros((1, H1P), jnp.float32).at[0, :H1].set(b1.astype(jnp.float32))
    b2p = jnp.zeros((1, H2P), jnp.float32).at[0, :H2].set(b2.astype(jnp.float32))
    w3r = jnp.zeros((1, H2P), jnp.float32).at[0, :H2].set(w3[0, :].astype(jnp.float32))
    b3p = b3.reshape(1, 1).astype(jnp.float32)
    return (w1t, b1p, w2x, w2a, b2p, w3r, b3p)


def _round_up(n, m):
    return ((n + m - 1) // m) * m


def critic_forward(x, a, prepped, *, tm=None):
    """x: [B, NS] f32, a: [B, NA] f32, prepped = prepare_params(...) -> q: [B, 1] f32."""
    w1t, b1p, w2x, w2a, b2p, w3r, b3p = prepped
    dtype = w1t.dtype
    B = x.shape[0]

    if tm is None:
        tm = min(DEFAULT_TM, _round_up(B, 8))           # multiple of 8 (f32 sublane)
    bp = _round_up(B, tm)
    if bp != B:
        x = jnp.pad(x, ((0, bp - B), (0, 0)))
        a = jnp.pad(a, ((0, bp - B), (0, 0)))
    x = x.astype(dtype)
    a = a.astype(dtype)

    grid = (bp // tm,)

    # Advisory cost hint for the XLA scheduler.
    flops = 2 * bp * (NS * H1P + (H1P + NA) * H2P + H2P)
    weight_bytes = (w1t.size + w2x.size + w2a.size) * 2 \
        + (b1p.size + b2p.size + w3r.size + b3p.size) * 4
    bytes_accessed = bp * (NS + NA) * 2 + bp * OUT * 4 + weight_bytes
    cost = pl.CostEstimate(flops=flops, transcendentals=0,
                           bytes_accessed=bytes_accessed)

    out = pl.pallas_call(
        critic_kernel,
        out_shape=jax.ShapeDtypeStruct((bp, OUT), jnp.float32),
        grid_spec=pltpu.PrefetchScalarGridSpec(
            num_scalar_prefetch=0,
            grid=grid,
            in_specs=[
                # batch-tiled activations
                pl.BlockSpec((tm, NS), lambda i: (i, 0)),      # x
                pl.BlockSpec((tm, NA), lambda i: (i, 0)),      # a
                # weights / biases: constant index_map -> resident across steps
                pl.BlockSpec((NS, H1P), lambda i: (0, 0)),     # W1 (padded, bf16)
                pl.BlockSpec((1, H1P), lambda i: (0, 0)),      # b1 (f32)
                pl.BlockSpec((H1P, H2P), lambda i: (0, 0)),    # W2[:, :400].T (bf16)
                pl.BlockSpec((NA, H2P), lambda i: (0, 0)),     # W2[:, 400:].T (bf16)
                pl.BlockSpec((1, H2P), lambda i: (0, 0)),      # b2 (f32)
                pl.BlockSpec((1, H2P), lambda i: (0, 0)),      # W3 row (f32)
                pl.BlockSpec((1, 1), lambda i: (0, 0)),        # b3 (f32)
            ],
            out_specs=pl.BlockSpec((tm, OUT), lambda i: (i, 0)),
        ),
        compiler_params=pltpu.CompilerParams(
            dimension_semantics=("parallel",),          # megacore-shard the batch
            vmem_limit_bytes=32 * 1024 * 1024,          # safe on v5e/v6e/v7x
        ),
        cost_estimate=cost,
    )(x, a, w1t, b1p, w2x, w2a, b2p, w3r, b3p)
    return out[:B]


def fanin_init(key, size):
    # Mirrors the PyTorch fanin_init: uniform(-v, v), v = 1/sqrt(size[0]).
    v = 1.0 / jnp.sqrt(jnp.float32(size[0]))
    return jax.random.uniform(key, size, jnp.float32, -v, v)


def init_params(key):
    ks = jax.random.split(key, 6)
    # Weights in PyTorch [out, in] layout.
    w1 = fanin_init(ks[0], (H1, NS))
    w2 = fanin_init(ks[1], (H2, H1 + NA))
    w3 = jax.random.uniform(ks[2], (OUT, H2), jnp.float32, -DIS, DIS)
    # Biases: nn.Linear default uniform(-1/sqrt(fan_in), 1/sqrt(fan_in)).
    b1 = jax.random.uniform(ks[3], (H1,), jnp.float32,
                            -1.0 / jnp.sqrt(NS), 1.0 / jnp.sqrt(NS))
    b2 = jax.random.uniform(ks[4], (H2,), jnp.float32,
                            -1.0 / jnp.sqrt(H1 + NA), 1.0 / jnp.sqrt(H1 + NA))
    b3 = jax.random.uniform(ks[5], (OUT,), jnp.float32,
                            -1.0 / jnp.sqrt(H2), 1.0 / jnp.sqrt(H2))
    return (w1, b1, w2, b2, w3, b3)


def reference_forward(x, a, params):
    # Pure-JAX f32 reference with the original PyTorch-layout weights.
    w1, b1, w2, b2, w3, b3 = params
    h1 = jax.nn.relu(x @ w1.T + b1)
    h2 = jax.nn.relu(jnp.concatenate([h1, a], axis=1) @ w2.T + b2)
    return h2 @ w3.T + b3


if __name__ == "__main__":
    key = jax.random.PRNGKey(0)
    kp, kx, ka = jax.random.split(key, 3)

    params = init_params(kp)
    prepped = prepare_params(params)          # one-time re-layout / pad / bf16 cast

    B = 2
    x = jax.random.normal(kx, (B, NS), jnp.float32)
    a = jax.random.normal(ka, (B, NA), jnp.float32)

    q = critic_forward(x, a, prepped)
    q = jax.block_until_ready(q)

    q_ref = reference_forward(x, a, params)
    assert q.shape == (B, OUT)
    # Kernel uses bf16 MXU inputs (f32 accumulation) -> loosened tolerance vs
    # the full-f32 reference.
    assert jnp.allclose(q, q_ref, atol=5e-3, rtol=5e-2), (q, q_ref)

    print("KERNEL_OK")
</pallas_src>

<mosaic_0001>
module attributes {stable_mosaic.version = 11 : i64} {
  func.func @critic_kernel(%arg0: i32, %arg1: memref<8x11xbf16, #tpu.memory_space<vmem>>, %arg2: memref<8x3xbf16, #tpu.memory_space<vmem>>, %arg3: memref<11x512xbf16, #tpu.memory_space<vmem>>, %arg4: memref<1x512xf32, #tpu.memory_space<vmem>>, %arg5: memref<512x384xbf16, #tpu.memory_space<vmem>>, %arg6: memref<3x384xbf16, #tpu.memory_space<vmem>>, %arg7: memref<1x384xf32, #tpu.memory_space<vmem>>, %arg8: memref<1x384xf32, #tpu.memory_space<vmem>>, %arg9: memref<1x1xf32, #tpu.memory_space<vmem>>, %arg10: memref<8x1xf32, #tpu.memory_space<vmem>>) attributes {dimension_semantics = [#tpu.dimension_semantics<parallel>], iteration_bounds = array<i64: 1>, scalar_prefetch = 0 : i64, scratch_operands = 0 : i64, tpu.core_type = #tpu.core_type<tc>, window_params = [{transform_indices = @transform_0, window_bounds = array<i64: 8, 11>}, {transform_indices = @transform_1, window_bounds = array<i64: 8, 3>}, {pipeline_mode = #tpu.pipeline_mode<synchronous>, transform_indices = @transform_2, window_bounds = array<i64: 11, 512>}, {pipeline_mode = #tpu.pipeline_mode<synchronous>, transform_indices = @transform_3, window_bounds = array<i64: 1, 512>}, {pipeline_mode = #tpu.pipeline_mode<synchronous>, transform_indices = @transform_4, window_bounds = array<i64: 512, 384>}, {pipeline_mode = #tpu.pipeline_mode<synchronous>, transform_indices = @transform_5, window_bounds = array<i64: 3, 384>}, {pipeline_mode = #tpu.pipeline_mode<synchronous>, transform_indices = @transform_6, window_bounds = array<i64: 1, 384>}, {pipeline_mode = #tpu.pipeline_mode<synchronous>, transform_indices = @transform_7, window_bounds = array<i64: 1, 384>}, {pipeline_mode = #tpu.pipeline_mode<synchronous>, transform_indices = @transform_8, window_bounds = array<i64: 1, 1>}, {transform_indices = @transform_9, window_bounds = array<i64: 8, 1>}]} {
    %c0 = arith.constant 0 : index
    %c0_0 = arith.constant 0 : index
    %0 = vector.load %arg1[%c0, %c0_0] : memref<8x11xbf16, #tpu.memory_space<vmem>>, vector<8x11xbf16>
    %c0_1 = arith.constant 0 : index
    %c0_2 = arith.constant 0 : index
    %1 = vector.load %arg3[%c0_1, %c0_2] : memref<11x512xbf16, #tpu.memory_space<vmem>>, vector<11x512xbf16>
    %cst = arith.constant dense<0.000000e+00> : vector<8x512xf32>
    %2 = tpu.matmul %0, %1, %cst {dimension_numbers = #tpu.dot_dimension_numbers<[1], [0], [0], [1], [0, 0, 1, 1], [], []>} : vector<8x11xbf16>, vector<11x512xbf16>, vector<8x512xf32> -> vector<8x512xf32>
    %c0_3 = arith.constant 0 : index
    %c0_4 = arith.constant 0 : index
    %3 = vector.load %arg4[%c0_3, %c0_4] : memref<1x512xf32, #tpu.memory_space<vmem>>, vector<1x512xf32>
    %4 = vector.broadcast %3 : vector<1x512xf32> to vector<8x512xf32>
    %5 = arith.addf %2, %4 : vector<8x512xf32>
    %cst_5 = arith.constant 0.000000e+00 : f32
    %6 = vector.broadcast %cst_5 : f32 to vector<8x512xf32>
    %7 = arith.maximumf %5, %6 : vector<8x512xf32>
    %8 = arith.truncf %7 : vector<8x512xf32> to vector<8x512xbf16>
    %c0_6 = arith.constant 0 : index
    %c0_7 = arith.constant 0 : index
    %9 = vector.load %arg5[%c0_6, %c0_7] : memref<512x384xbf16, #tpu.memory_space<vmem>>, vector<512x384xbf16>
    %cst_8 = arith.constant dense<0.000000e+00> : vector<8x384xf32>
    %10 = tpu.matmul %8, %9, %cst_8 {dimension_numbers = #tpu.dot_dimension_numbers<[1], [0], [0], [1], [0, 0, 1, 1], [], []>} : vector<8x512xbf16>, vector<512x384xbf16>, vector<8x384xf32> -> vector<8x384xf32>
    %c0_9 = arith.constant 0 : index
    %c0_10 = arith.constant 0 : index
    %11 = vector.load %arg2[%c0_9, %c0_10] : memref<8x3xbf16, #tpu.memory_space<vmem>>, vector<8x3xbf16>
    %c0_11 = arith.constant 0 : index
    %c0_12 = arith.constant 0 : index
    %12 = vector.load %arg6[%c0_11, %c0_12] : memref<3x384xbf16, #tpu.memory_space<vmem>>, vector<3x384xbf16>
    %cst_13 = arith.constant dense<0.000000e+00> : vector<8x384xf32>
    %13 = tpu.matmul %11, %12, %cst_13 {dimension_numbers = #tpu.dot_dimension_numbers<[1], [0], [0], [1], [0, 0, 1, 1], [], []>} : vector<8x3xbf16>, vector<3x384xbf16>, vector<8x384xf32> -> vector<8x384xf32>
    %14 = arith.addf %10, %13 : vector<8x384xf32>
    %c0_14 = arith.constant 0 : index
    %c0_15 = arith.constant 0 : index
    %15 = vector.load %arg7[%c0_14, %c0_15] : memref<1x384xf32, #tpu.memory_space<vmem>>, vector<1x384xf32>
    %16 = vector.broadcast %15 : vector<1x384xf32> to vector<8x384xf32>
    %17 = arith.addf %14, %16 : vector<8x384xf32>
    %cst_16 = arith.constant 0.000000e+00 : f32
    %18 = vector.broadcast %cst_16 : f32 to vector<8x384xf32>
    %19 = arith.maximumf %17, %18 : vector<8x384xf32>
    %c0_17 = arith.constant 0 : index
    %c0_18 = arith.constant 0 : index
    %20 = vector.load %arg8[%c0_17, %c0_18] : memref<1x384xf32, #tpu.memory_space<vmem>>, vector<1x384xf32>
    %21 = vector.broadcast %20 : vector<1x384xf32> to vector<8x384xf32>
    %22 = arith.mulf %19, %21 : vector<8x384xf32>
    %cst_19 = arith.constant dense<0.000000e+00> : vector<8xf32>
    %23 = vector.multi_reduction <add>, %22, %cst_19 [1] : vector<8x384xf32> to vector<8xf32>
    %24 = vector.shape_cast %23 : vector<8xf32> to vector<8x1xf32>
    %c0_20 = arith.constant 0 : index
    %c0_21 = arith.constant 0 : index
    %25 = vector.load %arg9[%c0_20, %c0_21] : memref<1x1xf32, #tpu.memory_space<vmem>>, vector<1x1xf32>
    %26 = vector.broadcast %25 : vector<1x1xf32> to vector<8x1xf32>
    %27 = arith.addf %24, %26 : vector<8x1xf32>
    %c0_22 = arith.constant 0 : index
    %c0_23 = arith.constant 0 : index
    %28 = vector.load %arg10[%c0_22, %c0_23] : memref<8x1xf32, #tpu.memory_space<vmem>>, vector<8x1xf32>
    tpu.vector_store %arg10[%c0_22, %c0_23], %27 {strides = array<i32>} : memref<8x1xf32, #tpu.memory_space<vmem>>, vector<8x1xf32>,
    return
  }
  func.func @transform_0(%arg0: i32) -> (i32, i32) {
    %c0_i32 = arith.constant 0 : i32
    %c0_i32_0 = arith.constant 0 : i32
    return %arg0, %c0_i32 : i32, i32
  }
  func.func @transform_1(%arg0: i32) -> (i32, i32) {
    %c0_i32 = arith.constant 0 : i32
    %c0_i32_0 = arith.constant 0 : i32
    return %arg0, %c0_i32 : i32, i32
  }
  func.func @transform_2(%arg0: i32) -> (i32, i32) {
    %c0_i32 = arith.constant 0 : i32
    %c0_i32_0 = arith.constant 0 : i32
    %c0_i32_1 = arith.constant 0 : i32
    return %c0_i32, %c0_i32_0 : i32, i32
  }
  func.func @transform_3(%arg0: i32) -> (i32, i32) {
    %c0_i32 = arith.constant 0 : i32
    %c0_i32_0 = arith.constant 0 : i32
    %c0_i32_1 = arith.constant 0 : i32
    return %c0_i32, %c0_i32_0 : i32, i32
  }
  func.func @transform_4(%arg0: i32) -> (i32, i32) {
    %c0_i32 = arith.constant 0 : i32
    %c0_i32_0 = arith.constant 0 : i32
    %c0_i32_1 = arith.constant 0 : i32
    return %c0_i32, %c0_i32_0 : i32, i32
  }
  func.func @transform_5(%arg0: i32) -> (i32, i32) {
    %c0_i32 = arith.constant 0 : i32
    %c0_i32_0 = arith.constant 0 : i32
    %c0_i32_1 = arith.constant 0 : i32
    return %c0_i32, %c0_i32_0 : i32, i32
  }
  func.func @transform_6(%arg0: i32) -> (i32, i32) {
    %c0_i32 = arith.constant 0 : i32
    %c0_i32_0 = arith.constant 0 : i32
    %c0_i32_1 = arith.constant 0 : i32
    return %c0_i32, %c0_i32_0 : i32, i32
  }
  func.func @transform_7(%arg0: i32) -> (i32, i32) {
    %c0_i32 = arith.constant 0 : i32
    %c0_i32_0 = arith.constant 0 : i32
    %c0_i32_1 = arith.constant 0 : i32
    return %c0_i32, %c0_i32_0 : i32, i32
  }
  func.func @transform_8(%arg0: i32) -> (i32, i32) {
    %c0_i32 = arith.constant 0 : i32
    %c0_i32_0 = arith.constant 0 : i32
    %c0_i32_1 = arith.constant 0 : i32
    return %c0_i32, %c0_i32_0 : i32, i32
  }
  func.func @transform_9(%arg0: i32) -> (i32, i32) {
    %c0_i32 = arith.constant 0 : i32
    %c0_i32_0 = arith.constant 0 : i32
    return %arg0, %c0_i32 : i32, i32
  }
}

</mosaic_0001>

<bundles_post_ra>
// kernel: tpu_custom_call.1
= control target key start
LH: loop header
LB: loop body
LE: loop exit
PB: predicated region body
PF: predicated region fallthrough
CT: control target
= control target key end

     0   :  { %s1697_s0 = inlined_call_operand.vmem [shape: bf16[8,11], index: 0, kind: input, shape index: {}]   ;;  %s1698_s1 = inlined_call_operand.vmem [shape: bf16[8,3], index: 1, kind: input, shape index: {}]   ;;  %s1699_s2 = inlined_call_operand.hbm [shape: bf16[11,512], index: 2, kind: input, shape index: {}]   ;;  %s1700_s3 = inlined_call_operand.vmem [shape: f32[1,512], index: 3, kind: input, shape index: {}]   ;;  %s1701_s4 = inlined_call_operand.hbm [shape: bf16[512,384], index: 4, kind: input, shape index: {}]   ;;  %s1702_s5 = inlined_call_operand.vmem [shape: bf16[3,384], index: 5, kind: input, shape index: {}]   ;;  %s1703_s6 = inlined_call_operand.vmem [shape: f32[1,384], index: 6, kind: input, shape index: {}]   ;;  %s1704_s7 = inlined_call_operand.vmem [shape: f32[1,384], index: 7, kind: input, shape index: {}]   ;;  %s1705_s8 = inlined_call_operand.<no memory space> [shape: f32[1,1], index: 8, kind: input, shape index: {}]   ;;  %s1706_s9 = inlined_call_operand.vmem [shape: f32[8,1], index: 9, kind: output, shape index: {}]  }
   0x1   :  { %v14_v0 = vstv %s1705_s8 }
   0x2   :  { %15 = vst [vmem:[#allocation2] sm:$0x1] %v14_v0 }
   0x3   :  { %16 = vsyncpa [#allocation4], 0 }
   0x4   :  { %17 = vsyncpa [#allocation6], 0  ;;  %s1549_s11 = smov [#allocation3]   ;;  %s1501_s15 = scalar_lea.hbm %s1699_s2, 512 }
   0x5   :  { %s27_s12 = sshll.u32 %s1549_s11, 4  ;;  %p1502_p0 = scmp.ne.s32.totalorder %s1699_s2, %s1501_s15  ;;  %s28_s12 = int_to_ptr.vmem [resolvable:$true] %s27_s12 }
   0x6   :  { %p1505_p1 = scmp.lt.u32.totalorder %s1501_s15, %s1699_s2 }
   0x8   :  { %p1507_p2 = pnand %p1505_p1, %p1502_p0 }
   0xa   :  { %1510 = shalt.err (!%p1507_p2)
}
   0xb   :  { %s1511_s8 = scalar_lea.vmem %s28_s12, 512  ;;  %p1516_p4 = scmp.lt.s32.totalorder %s28_s12, %s28_s12 }
   0xc   :  { %p1512_p3 = scmp.ne.s32.totalorder %s28_s12, %s1511_s8  ;;  %p1517_p5 = scmp.lt.s32.totalorder %s1511_s8, %s1511_s8 }
   0xe   :  { %p1518_p6 = por %p1517_p5, %p1516_p4 }
  0x10   :  { %p1519_p7 = pnand %p1518_p6, %p1512_p3 }
  0x12   :  { %1522 = shalt.err (!%p1519_p7)
}
  0x13   :  { %s1550_s20 = smov 256   ;;  %s1551_s21 = smov 16  }
  0x14   :  { %33 = dma.hbm_to_vmem [thread:$0]  %s1699_s2, 512, %s28_s12, [#allocation4], %s1550_s20, %s1550_s20, %s1551_s21  }
  0x15   :  { %s1552_s24 = smov [#allocation5]   ;;  %s1523_s28 = scalar_lea.hbm %s1701_s4, 12288 }
  0x16   :  { %s41_s25 = sshll.u32 %s1552_s24, 4  ;;  %p1524_p8 = scmp.ne.s32.totalorder %s1701_s4, %s1523_s28  ;;  %s42_s25 = int_to_ptr.vmem [resolvable:$true] %s41_s25 }
  0x17   :  { %p1527_p9 = scmp.lt.u32.totalorder %s1523_s28, %s1701_s4 }
  0x19   :  { %p1529_p10 = pnand %p1527_p9, %p1524_p8 }
  0x1b   :  { %1532 = shalt.err (!%p1529_p10)
}
  0x1c   :  { %s1533_s13 = scalar_lea.vmem %s42_s25, 12288  ;;  %p1538_p12 = scmp.lt.s32.totalorder %s42_s25, %s42_s25 }
  0x1d   :  { %p1534_p11 = scmp.ne.s32.totalorder %s42_s25, %s1533_s13  ;;  %p1539_p13 = scmp.lt.s32.totalorder %s1533_s13, %s1533_s13 }
  0x1f   :  { %p1540_p0 = por %p1539_p13, %p1538_p12 }
  0x21   :  { %p1541_p1 = pnand %p1540_p0, %p1534_p11 }
  0x23   :  { %1544 = shalt.err (!%p1541_p1)
}
  0x24   :  { %s1553_s2 = smov 192   ;;  %s1554_s12 = smov 12  }
  0x25   :  { %47 = dma.hbm_to_vmem [thread:$0]  %s1701_s4, 12288, %s42_s25, [#allocation6], %s1553_s2, %s1553_s2, %s1554_s12  }
  0x26   :  { %1545 = dma.done.wait [#allocation4], 512  }
  0x27   :  { %1546 = vsyncadd [#allocation4], 4294966784 }
  0x28   :  { %1547 = dma.done.wait [#allocation6], 12288  }
  0x29   :  { %1548 = vsyncadd [#allocation6], 4294955008  ;;  %vm110_vm0 = vcmask 1044480   ;;  %v1555_v1 = vmov 0   ;;  %v70_v2 = vlaneseq  ;;  %vm111_vm1 = vcmask 1045504  }
  0x2a   :  { %158 = vmatprep.mubr.bf16.mxu0 %v1555_v1  ;;  %199 = vmatprep.mubr.bf16.mxu1 %v1555_v1  ;;  %v1556_v3 = vmov 65535   ;;  %vm367_vm2 = vcmask 1040384   ;;  %v1557_v5 = vmov 1983009808   ;;  %vm368_vm3 = vcmask 1041408  }
  0x2b   :  { %v112_v4 = vsel %vm110_vm0, 4294967295, %v1556_v3  ;;  %v349_v6 = vunpack.c.l.s4 %v1557_v5  ;;  %v1637_v7 = vshrl.u32 %v70_v2, 7  ;;  %v369_v10 = vsel %vm367_vm2, 4294967295, %v1556_v3  ;;  %v1366_v11 = vld [vmem:[#allocation3 + $0x4] ss:$16 sps:$4 sm:$0x3f]  }
  0x2c   :  { %v113_v9 = vsel %vm111_vm1, %v112_v4, 0  ;;  %v1368_v13 = vld [vmem:[#allocation3 + $0xc] ss:$16 sps:$4 sm:$0x3f]   ;;  %v345_v18 = vld [vmem:[%s1702_s5] sm:$0x3f] }
  0x2d   :  { %v350_v8 = vunpack.c.0.s8 %v349_v6  ;;  %v118_v14 = vand.u32 %v1366_v11, %v113_v9  ;;  %v1370_v15 = vld [vmem:[#allocation3] ss:$16 sps:$4 sm:$0x3f]   ;;  %v1371_v16 = vld [vmem:[#allocation3 + $0x8] ss:$16 sps:$4 sm:$0x3f]   ;;  %v124_v17 = vand.u32 %v1368_v13, %v113_v9  ;;  %v347_v22 = vcombine.high %v345_v18, %v345_v18 }
  0x2e   :  { %v370_v19 = vsel %vm368_vm3, %v369_v10, 0  ;;  %v115_v20 = vand.u32 %v1370_v15, %v113_v9  ;;  %v121_v21 = vand.u32 %v1371_v16, %v113_v9  ;;  %v63_v24 = vld [vmem:[%s1697_s0] sm:$0xf]  ;;  %vm106_vm4 = vcmask 89088   ;;  %v1375_v31 = vld [vmem:[#allocation5 + $0x4] ss:$12 sps:$4 sm:$0xff]  }
  0x2f   :  { %v353_v12 = vsub.s32 %v350_v8, %v1637_v7  ;;  %126 = vmatprep.subr.bf16.mxu0 %v118_v14  ;;  %167 = vmatprep.subr.bf16.mxu1 %v124_v17  ;;  %v1558_v28 = vmov 0.0   ;;  %v1378_v32 = vld [vmem:[#allocation5 + $0x184] ss:$12 sps:$4 sm:$0xff]   ;;  %vm1559_vm5 = vmmov 0   ;;  %v344_v33 = vld [vmem:[%s1698_s1] sm:$0xf] }
  0x30   :  { %127 = vmatpush1.bf16.msra.mxu0 %v115_v20  ;;  %168 = vmatpush1.bf16.msra.mxu1 %v121_v21  ;;  %vm363_vm6 = vcmask 23552   ;;  %v1373_v34 = vld [vmem:[#allocation5] ss:$12 sps:$4 sm:$0xff]   ;;  %v1381_v36 = vld [vmem:[#allocation5 + $0x1c] ss:$12 sps:$4 sm:$0xff]   ;;  %vm1190_vm7 = vcmask 7168  }
  0x31   :  { %v354_v23 = vrot.slane %v345_v18, %v353_v12  ;;  %v361_v26 = vrot.slane %v347_v22, %v353_v12  ;;  %1349 = vmatprep.subr.bf16.mxu1 %v1558_v28  ;;  %v1376_v35 = vld [vmem:[#allocation5 + $0x180] ss:$12 sps:$4 sm:$0xff]   ;;  %v1384_v37 = vld [vmem:[#allocation5 + $0x19c] ss:$12 sps:$4 sm:$0xff]   ;;  %v1379_v38 = vld [vmem:[#allocation5 + $0x18] ss:$12 sps:$4 sm:$0xff]  }
  0x32   :  { %v1382_v39 = vld [vmem:[#allocation5 + $0x198] ss:$12 sps:$4 sm:$0xff]   ;;  %v1387_v40 = vld [vmem:[#allocation5 + $0x34] ss:$12 sps:$4 sm:$0xff]   ;;  %v1385_v42 = vld [vmem:[#allocation5 + $0x30] ss:$12 sps:$4 sm:$0xff]  }
  0x33   :  { %v362_v25 = vcombine.high %v354_v23, %v354_v23  ;;  %v372_v27 = vand.u32 %v370_v19, %v354_v23  ;;  %v378_v30 = vand.u32 %v370_v19, %v361_v26  ;;  %1202 = vmatmul.mubr.msk.bf16.vlgmr.msra.gmra.mrb[0].mxu0 %vm106_vm4, %v63_v24  ;;  %1203 = vmatmul.mubr.msk.bf16.vlgmr.msra.gmra.mrb[0].mxu1 %vm106_vm4, %v63_v24  ;;  %v1390_v41 = vld [vmem:[#allocation5 + $0x1b4] ss:$12 sps:$4 sm:$0xff]   ;;  %v1388_v43 = vld [vmem:[#allocation5 + $0x1b0] ss:$12 sps:$4 sm:$0xff]   ;;  %v1393_v44 = vld [vmem:[#allocation5 + $0x4c] ss:$12 sps:$4 sm:$0xff]  }
  0x34   :  { %412 = vmatprep.mubr.bf16.mxu0 %v1555_v1  ;;  %1351 = vmatprep.mubr.msk.bf16.mxu1 %vm1559_vm5, %v1558_v28  ;;  %v1396_v45 = vld [vmem:[#allocation5 + $0x1cc] ss:$12 sps:$4 sm:$0xff]   ;;  %v1391_v46 = vld [vmem:[#allocation5 + $0x48] ss:$12 sps:$4 sm:$0xff]   ;;  %v1399_v48 = vld [vmem:[#allocation5 + $0x64] ss:$12 sps:$4 sm:$0xff]  }
  0x35   :  { %v375_v29 = vand.u32 %v370_v19, %v362_v25  ;;  %1350 = vmatpush3.bf16.msra.mxu1 %v378_v30  ;;  %v1394_v47 = vld [vmem:[#allocation5 + $0x1c8] ss:$12 sps:$4 sm:$0xff]   ;;  %v1402_v49 = vld [vmem:[#allocation5 + $0x1e4] ss:$12 sps:$4 sm:$0xff]   ;;  %v1397_v50 = vld [vmem:[#allocation5 + $0x60] ss:$12 sps:$4 sm:$0xff]  }
  0x36   :  { %1014 = vmatprep.subr.bf16.mxu1 %v1378_v32  ;;  %v1400_v51 = vld [vmem:[#allocation5 + $0x1e0] ss:$12 sps:$4 sm:$0xff]   ;;  %v1405_v52 = vld [vmem:[#allocation5 + $0x7c] ss:$12 sps:$4 sm:$0xff]   ;;  %v1403_v54 = vld [vmem:[#allocation5 + $0x78] ss:$12 sps:$4 sm:$0xff]  }
  0x37   :  { %380 = vmatprep.subr.bf16.mxu0 %v375_v29  ;;  %v1408_v53 = vld [vmem:[#allocation5 + $0x1fc] ss:$12 sps:$4 sm:$0xff]   ;;  %v1406_v55 = vld [vmem:[#allocation5 + $0x1f8] ss:$12 sps:$4 sm:$0xff]   ;;  %v1411_v56 = vld [vmem:[#allocation5 + $0x94] ss:$12 sps:$4 sm:$0xff]  }
  0x38   :  { %381 = vmatpush1.bf16.msra.mxu0 %v372_v27  ;;  %v1414_v57 = vld [vmem:[#allocation5 + $0x214] ss:$12 sps:$4 sm:$0xff]   ;;  %v1409_v58 = vld [vmem:[#allocation5 + $0x90] ss:$12 sps:$4 sm:$0xff]   ;;  %v1417_v60 = vld [vmem:[#allocation5 + $0xac] ss:$12 sps:$4 sm:$0xff]  }
  0x39   :  { %973 = vmatprep.subr.bf16.mxu0 %v1375_v31  ;;  %v1412_v59 = vld [vmem:[#allocation5 + $0x210] ss:$12 sps:$4 sm:$0xff]   ;;  %v1420_v61 = vld [vmem:[#allocation5 + $0x22c] ss:$12 sps:$4 sm:$0xff]   ;;  %v1415_v62 = vld [vmem:[#allocation5 + $0xa8] ss:$12 sps:$4 sm:$0xff]  }
  0x3a   :  { %v1418_v63 = vld [vmem:[#allocation5 + $0x228] ss:$12 sps:$4 sm:$0xff]   ;;  %v1423_v0 = vld [vmem:[#allocation5 + $0xc4] ss:$12 sps:$4 sm:$0xff]   ;;  %v1421_v2 = vld [vmem:[#allocation5 + $0xc0] ss:$12 sps:$4 sm:$0xff]  }
  0x3b   :  { %1204 = vmatmul.mubr.msk.bf16.vlgmr.msra.gmra.mrb[4].mxu0 %vm363_vm6, %v344_v33  ;;  %1352 = vmatmul.mubr.msk.bf16.vlgmr.msra.gmra.mrb[4].mxu1 %vm363_vm6, %v344_v33  ;;  %v1426_v1 = vld [vmem:[#allocation5 + $0x244] ss:$12 sps:$4 sm:$0xff]   ;;  %v1424_v3 = vld [vmem:[#allocation5 + $0x240] ss:$12 sps:$4 sm:$0xff]   ;;  %v1429_v4 = vld [vmem:[#allocation5 + $0xdc] ss:$12 sps:$4 sm:$0xff]  }
  0x3c   :  { %974 = vmatpush1.bf16.msra.mxu0 %v1373_v34  ;;  %1015 = vmatpush1.bf16.msra.mxu1 %v1376_v35  ;;  %v1432_v5 = vld [vmem:[#allocation5 + $0x25c] ss:$12 sps:$4 sm:$0xff]   ;;  %v1427_v6 = vld [vmem:[#allocation5 + $0xd8] ss:$12 sps:$4 sm:$0xff]   ;;  %v1435_v9 = vld [vmem:[#allocation5 + $0xf4] ss:$12 sps:$4 sm:$0xff]  }
  0x3d   :  { %975 = vmatprep.subr.bf16.mxu0 %v1381_v36  ;;  %1016 = vmatprep.subr.bf16.mxu1 %v1384_v37  ;;  %v1430_v8 = vld [vmem:[#allocation5 + $0x258] ss:$12 sps:$4 sm:$0xff]   ;;  %v1438_v10 = vld [vmem:[#allocation5 + $0x274] ss:$12 sps:$4 sm:$0xff]   ;;  %v1433_v11 = vld [vmem:[#allocation5 + $0xf0] ss:$12 sps:$4 sm:$0xff]  }
  0x3e   :  { %v1436_v12 = vld [vmem:[#allocation5 + $0x270] ss:$12 sps:$4 sm:$0xff]   ;;  %v1441_v13 = vld [vmem:[#allocation5 + $0x10c] ss:$12 sps:$4 sm:$0xff]   ;;  %v1439_v15 = vld [vmem:[#allocation5 + $0x108] ss:$12 sps:$4 sm:$0xff]  }
  0x3f   :  { %v1444_v14 = vld [vmem:[#allocation5 + $0x28c] ss:$12 sps:$4 sm:$0xff]   ;;  %v1442_v16 = vld [vmem:[#allocation5 + $0x288] ss:$12 sps:$4 sm:$0xff]   ;;  %v1447_v17 = vld [vmem:[#allocation5 + $0x124] ss:$12 sps:$4 sm:$0xff]  }
  0x40   :  { %976 = vmatpush1.bf16.msra.mxu0 %v1379_v38  ;;  %1017 = vmatpush1.bf16.msra.mxu1 %v1382_v39  ;;  %v1450_v18 = vld [vmem:[#allocation5 + $0x2a4] ss:$12 sps:$4 sm:$0xff]   ;;  %v1445_v19 = vld [vmem:[#allocation5 + $0x120] ss:$12 sps:$4 sm:$0xff]   ;;  %v1453_v21 = vld [vmem:[#allocation5 + $0x13c] ss:$12 sps:$4 sm:$0xff]  }
  0x41   :  { %977 = vmatprep.subr.bf16.mxu0 %v1387_v40  ;;  %1018 = vmatprep.subr.bf16.mxu1 %v1390_v41  ;;  %v1448_v20 = vld [vmem:[#allocation5 + $0x2a0] ss:$12 sps:$4 sm:$0xff]   ;;  %v1456_v22 = vld [vmem:[#allocation5 + $0x2bc] ss:$12 sps:$4 sm:$0xff]   ;;  %v1451_v23 = vld [vmem:[#allocation5 + $0x138] ss:$12 sps:$4 sm:$0xff]  }
  0x42   :  { %v1454_v24 = vld [vmem:[#allocation5 + $0x2b8] ss:$12 sps:$4 sm:$0xff]   ;;  %v1459_v25 = vld [vmem:[#allocation5 + $0x154] ss:$12 sps:$4 sm:$0xff]   ;;  %v1457_v27 = vld [vmem:[#allocation5 + $0x150] ss:$12 sps:$4 sm:$0xff]  }
  0x43   :  { %v1462_v26 = vld [vmem:[#allocation5 + $0x2d4] ss:$12 sps:$4 sm:$0xff]   ;;  %v1460_v28 = vld [vmem:[#allocation5 + $0x2d0] ss:$12 sps:$4 sm:$0xff]   ;;  %v1465_v29 = vld [vmem:[#allocation5 + $0x16c] ss:$12 sps:$4 sm:$0xff]  }
  0x44   :  { %978 = vmatpush1.bf16.msra.mxu0 %v1385_v42  ;;  %1019 = vmatpush1.bf16.msra.mxu1 %v1388_v43  ;;  %v1468_v30 = vld [vmem:[#allocation5 + $0x2ec] ss:$12 sps:$4 sm:$0xff]   ;;  %v1463_v31 = vld [vmem:[#allocation5 + $0x168] ss:$12 sps:$4 sm:$0xff]   ;;  %v1650_v35 = vsub.s32 0, %v1637_v7  ;;  %v1653_v36 = vsub.s32 2, %v1637_v7 }
  0x45   :  { %979 = vmatprep.subr.bf16.mxu0 %v1393_v44  ;;  %1020 = vmatprep.subr.bf16.mxu1 %v1396_v45  ;;  %v1466_v32 = vld [vmem:[#allocation5 + $0x2e8] ss:$12 sps:$4 sm:$0xff]   ;;  %v68_v37 = vld [vmem:[%s1700_s3] sm:$0xf]  ;;  %v1659_v38 = vsub.s32 1, %v1637_v7  ;;  %v84_v39 = vsub.s32 3, %v1637_v7 }
  0x46   :  { %v1469_v33 = vld [vmem:[#allocation5 + $0xc8] ss:$12 sps:$4 sm:$0xff]   ;;  %v73_v40 = vrot.slane %v68_v37, %v1650_v35  ;;  %v81_v41 = vrot.slane %v68_v37, %v1653_v36 }
  0x47   :  { %v1470_v34 = vld [vmem:[#allocation5 + $0x248] ss:$12 sps:$4 sm:$0xff]   ;;  %v77_v42 = vrot.slane %v68_v37, %v1659_v38  ;;  %v85_v43 = vrot.slane %v68_v37, %v84_v39  ;;  %v1498_v37 = vld [vmem:[#allocation5 + $0x2f0] ss:$12 sps:$4 sm:$0xff]  }
  0x48   :  { %980 = vmatpush1.bf16.msra.mxu0 %v1391_v46  ;;  %1021 = vmatpush1.bf16.msra.mxu1 %v1394_v47  ;;  %v1499_v39 = vld [vmem:[#allocation5 + $0xb0] ss:$12 sps:$4 sm:$0xff]  }
  0x49   :  { %981 = vmatprep.subr.bf16.mxu0 %v1399_v48  ;;  %1022 = vmatprep.subr.bf16.mxu1 %v1402_v49 }
  0x4c   :  { %982 = vmatpush1.bf16.msra.mxu0 %v1397_v50  ;;  %1023 = vmatpush1.bf16.msra.mxu1 %v1400_v51 }
  0x4d   :  { %983 = vmatprep.subr.bf16.mxu0 %v1405_v52  ;;  %1024 = vmatprep.subr.bf16.mxu1 %v1408_v53 }
  0x50   :  { %984 = vmatpush1.bf16.msra.mxu0 %v1403_v54  ;;  %1025 = vmatpush1.bf16.msra.mxu1 %v1406_v55 }
  0x51   :  { %985 = vmatprep.subr.bf16.mxu0 %v1411_v56  ;;  %1026 = vmatprep.subr.bf16.mxu1 %v1414_v57 }
  0x54   :  { %986 = vmatpush1.bf16.msra.mxu0 %v1409_v58  ;;  %1027 = vmatpush1.bf16.msra.mxu1 %v1412_v59 }
  0x55   :  { %987 = vmatprep.subr.bf16.mxu0 %v1417_v60  ;;  %1028 = vmatprep.subr.bf16.mxu1 %v1420_v61 }
  0x58   :  { %988 = vmatpush1.bf16.msra.mxu0 %v1415_v62  ;;  %1029 = vmatpush1.bf16.msra.mxu1 %v1418_v63  ;;  %v1471_v62 = vld [vmem:[#allocation5 + $0x8] ss:$12 sps:$4 sm:$0xff]  }
  0x59   :  { %989 = vmatprep.subr.bf16.mxu0 %v1423_v0  ;;  %1030 = vmatprep.subr.bf16.mxu1 %v1426_v1  ;;  %v1472_v63 = vld [vmem:[#allocation5 + $0x188] ss:$12 sps:$4 sm:$0xff]   ;;  %v1473_v1 = vld [vmem:[#allocation5 + $0xe0] ss:$12 sps:$4 sm:$0xff]  }
  0x5c   :  { %990 = vmatpush1.bf16.msra.mxu0 %v1421_v2  ;;  %1031 = vmatpush1.bf16.msra.mxu1 %v1424_v3  ;;  %v1474_v2 = vld [vmem:[#allocation5 + $0x260] ss:$12 sps:$4 sm:$0xff]  }
  0x5d   :  { %991 = vmatprep.subr.bf16.mxu0 %v1429_v4  ;;  %1032 = vmatprep.subr.bf16.mxu1 %v1432_v5 }
  0x60   :  { %992 = vmatpush1.bf16.msra.mxu0 %v1427_v6  ;;  %1033 = vmatpush1.bf16.msra.mxu1 %v1430_v8  ;;  %v1475_v8 = vld [vmem:[#allocation5 + $0x20] ss:$12 sps:$4 sm:$0xff]  }
  0x61   :  { %993 = vmatprep.subr.bf16.mxu0 %v1435_v9  ;;  %1034 = vmatprep.subr.bf16.mxu1 %v1438_v10  ;;  %v1476_v9 = vld [vmem:[#allocation5 + $0x1a0] ss:$12 sps:$4 sm:$0xff]  }
  0x64   :  { %994 = vmatpush1.bf16.msra.mxu0 %v1433_v11  ;;  %1035 = vmatpush1.bf16.msra.mxu1 %v1436_v12  ;;  %v1477_v12 = vld [vmem:[#allocation5 + $0xf8] ss:$12 sps:$4 sm:$0xff]  }
  0x65   :  { %995 = vmatprep.subr.bf16.mxu0 %v1441_v13  ;;  %1036 = vmatprep.subr.bf16.mxu1 %v1444_v14  ;;  %v1478_v13 = vld [vmem:[#allocation5 + $0x278] ss:$12 sps:$4 sm:$0xff]  }
  0x68   :  { %996 = vmatpush1.bf16.msra.mxu0 %v1439_v15  ;;  %1037 = vmatpush1.bf16.msra.mxu1 %v1442_v16  ;;  %v1479_v16 = vld [vmem:[#allocation5 + $0x38] ss:$12 sps:$4 sm:$0xff]  }
  0x69   :  { %997 = vmatprep.subr.bf16.mxu0 %v1447_v17  ;;  %1038 = vmatprep.subr.bf16.mxu1 %v1450_v18  ;;  %v1480_v17 = vld [vmem:[#allocation5 + $0x1b8] ss:$12 sps:$4 sm:$0xff]   ;;  %v1481_v18 = vld [vmem:[#allocation5 + $0x110] ss:$12 sps:$4 sm:$0xff]  }
  0x6c   :  { %998 = vmatpush1.bf16.msra.mxu0 %v1445_v19  ;;  %1039 = vmatpush1.bf16.msra.mxu1 %v1448_v20  ;;  %v1482_v19 = vld [vmem:[#allocation5 + $0x290] ss:$12 sps:$4 sm:$0xff]  }
  0x6d   :  { %999 = vmatprep.subr.bf16.mxu0 %v1453_v21  ;;  %1040 = vmatprep.subr.bf16.mxu1 %v1456_v22  ;;  %v1483_v20 = vld [vmem:[#allocation5 + $0x50] ss:$12 sps:$4 sm:$0xff]   ;;  %v1485_v22 = vld [vmem:[#allocation5 + $0x128] ss:$12 sps:$4 sm:$0xff]  }
  0x6e   :  { %v1484_v21 = vld [vmem:[#allocation5 + $0x1d0] ss:$12 sps:$4 sm:$0xff]  }
  0x70   :  { %1000 = vmatpush1.bf16.msra.mxu0 %v1451_v23  ;;  %1041 = vmatpush1.bf16.msra.mxu1 %v1454_v24  ;;  %v1486_v23 = vld [vmem:[#allocation5 + $0x2a8] ss:$12 sps:$4 sm:$0xff]  }
  0x71   :  { %1001 = vmatprep.subr.bf16.mxu0 %v1459_v25  ;;  %1042 = vmatprep.subr.bf16.mxu1 %v1462_v26  ;;  %v1487_v24 = vld [vmem:[#allocation5 + $0x68] ss:$12 sps:$4 sm:$0xff]   ;;  %v1489_v26 = vld [vmem:[#allocation5 + $0x140] ss:$12 sps:$4 sm:$0xff]  }
  0x72   :  { %v1488_v25 = vld [vmem:[#allocation5 + $0x1e8] ss:$12 sps:$4 sm:$0xff]  }
  0x74   :  { %1002 = vmatpush1.bf16.msra.mxu0 %v1457_v27  ;;  %1043 = vmatpush1.bf16.msra.mxu1 %v1460_v28  ;;  %v1490_v27 = vld [vmem:[#allocation5 + $0x2c0] ss:$12 sps:$4 sm:$0xff]  }
  0x75   :  { %1003 = vmatprep.subr.bf16.mxu0 %v1465_v29  ;;  %1044 = vmatprep.subr.bf16.mxu1 %v1468_v30  ;;  %v1491_v28 = vld [vmem:[#allocation5 + $0x80] ss:$12 sps:$4 sm:$0xff]   ;;  %v1493_v30 = vld [vmem:[#allocation5 + $0x158] ss:$12 sps:$4 sm:$0xff]  }
  0x76   :  { %v1492_v29 = vld [vmem:[#allocation5 + $0x200] ss:$12 sps:$4 sm:$0xff]  }
  0x78   :  { %1004 = vmatpush1.bf16.msra.mxu0 %v1463_v31  ;;  %1045 = vmatpush1.bf16.msra.mxu1 %v1466_v32  ;;  %v1494_v31 = vld [vmem:[#allocation5 + $0x2d8] ss:$12 sps:$4 sm:$0xff]  }
  0x79   :  { %1305 = vmatprep.subr.bf16.mxu0 %v1469_v33  ;;  %1327 = vmatprep.subr.bf16.mxu1 %v1470_v34  ;;  %v1495_v32 = vld [vmem:[#allocation5 + $0x98] ss:$12 sps:$4 sm:$0xff]   ;;  %v1497_v34 = vld [vmem:[#allocation5 + $0x170] ss:$12 sps:$4 sm:$0xff]  }
  0x7a   :  { %v1496_v33 = vld [vmem:[#allocation5 + $0x218] ss:$12 sps:$4 sm:$0xff]  }
 0x106   :  { %v160_v44 = vpop.f32.mrb[0].mxu0  ;;  %v201_v45 = vpop.f32.mrb[0].mxu1 }
 0x107   :  { %v161_v46 = vadd.f32 %v160_v44, %v73_v40  ;;  %v202_v47 = vadd.f32 %v201_v45, %v81_v41  ;;  %v162_v48 = vpop.f32.mrb[1].mxu0  ;;  %v203_v49 = vpop.f32.mrb[1].mxu1  ;;  %v1500_v40 = vld [vmem:[#allocation5 + $0x230] ss:$12 sps:$4 sm:$0xff]  }
 0x108   :  { %v163_v50 = vadd.f32 %v162_v48, %v77_v42  ;;  %v204_v51 = vadd.f32 %v203_v49, %v85_v43  ;;  %v164_v52 = vpop.f32.mrb[2].mxu0  ;;  %v205_v53 = vpop.f32.mrb[2].mxu1  ;;  %v1135_v41 = vld [vmem:[%s1703_s6] sm:$0x7] }
 0x109   :  { %v208_v54 = vmax.f32 %v161_v46, 0.0  ;;  %v210_v55 = vmax.f32 %v202_v47, 0.0  ;;  %v165_v7 = vpop.f32.mrb[3].mxu0  ;;  %v206_v56 = vpop.f32.mrb[3].mxu1  ;;  %v1140_v45 = vrot.slane %v1135_v41, %v1650_v35  ;;  %v1144_v49 = vrot.slane %v1135_v41, %v1659_v38  ;;  %v1158_v52 = vld [vmem:[%s1704_s7] sm:$0x7] }
 0x10a   :  { %v209_v57 = vmax.f32 %v163_v50, 0.0  ;;  %v211_v58 = vmax.f32 %v204_v51, 0.0 }
 0x10b   :  { %v1665_v59 = vpack.c.bf16 %v210_v55, %v210_v55  ;;  %v1667_v0 = vpack.c.bf16 %v208_v54, %v208_v54 }
 0x10c   :  { %v213_v60 = vpack.c.bf16 %v209_v57, %v209_v57  ;;  %v215_v61 = vpack.c.bf16 %v211_v58, %v211_v58  ;;  %v1163_v57 = vrot.slane %v1158_v52, %v1650_v35 }
 0x10e   :  { %1005 = vmatprep.mubr.bf16.mxu0 %v213_v60  ;;  %1046 = vmatprep.mubr.bf16.mxu1 %v215_v61  ;;  %v1669_v3 = vpop.f32.mrb[4].mxu0  ;;  %v1671_v4 = vpop.f32.mrb[4].mxu1 }
 0x10f   :  { %1006 = vmatmul.mubr.bf16.vlgmr.msra.gmra.mrb[8].mxu0 %v1667_v0  ;;  %1047 = vmatmul.mubr.bf16.vlgmr.msra.gmra.mrb[8].mxu1 %v1665_v59  ;;  %v1675_v5 = vpop.f32.mrb[5].mxu0  ;;  %v1353_v6 = vpop.f32.mrb[5].mxu1 }
 0x110   :  { %1306 = vmatpush3.bf16.msra.mxu0 %v1471_v62  ;;  %1328 = vmatpush3.bf16.msra.mxu1 %v1472_v63  ;;  %v418_v10 = vpop.f32.mrb[6].mxu0  ;;  %v458_v11 = vpop.f32.mrb[6].mxu1 }
 0x111   :  { %1087 = vmatprep.mubr.bf16.mxu0 %v213_v60  ;;  %1127 = vmatprep.mubr.bf16.mxu1 %v215_v61  ;;  %v419_v14 = vpop.f32.mrb[7].mxu0  ;;  %v1354_v15 = vpop.f32.mrb[7].mxu1 }
 0x112   :  { %1307 = vmatprep.subr.bf16.mxu0 %v1473_v1  ;;  %1329 = vmatprep.subr.bf16.mxu1 %v1474_v2  ;;  %v1171_v15 = vrot.slane %v1158_v52, %v1653_v36 }
 0x114   :  { %1308 = vmatpush3.bf16.msra.mxu0 %v1475_v8  ;;  %1330 = vmatpush3.bf16.msra.mxu1 %v1476_v9 }
 0x115   :  { %1309 = vmatprep.subr.bf16.mxu0 %v1477_v12  ;;  %1331 = vmatprep.subr.bf16.mxu1 %v1478_v13  ;;  %v1148_v13 = vrot.slane %v1135_v41, %v1653_v36 }
 0x118   :  { %1310 = vmatpush3.bf16.msra.mxu0 %v1479_v16  ;;  %1332 = vmatpush3.bf16.msra.mxu1 %v1480_v17 }
 0x119   :  { %1311 = vmatprep.subr.bf16.mxu0 %v1481_v18  ;;  %1333 = vmatprep.subr.bf16.mxu1 %v1482_v19  ;;  %v1302_v19 = vld [vmem:[#allocation2] ss:$0 sm:$0xff] }
 0x11c   :  { %1312 = vmatpush3.bf16.msra.mxu0 %v1483_v20  ;;  %1334 = vmatpush3.bf16.msra.mxu1 %v1484_v21 }
 0x11d   :  { %1313 = vmatprep.subr.bf16.mxu0 %v1485_v22  ;;  %1335 = vmatprep.subr.bf16.mxu1 %v1486_v23 }
 0x120   :  { %1314 = vmatpush3.bf16.msra.mxu0 %v1487_v24  ;;  %1336 = vmatpush3.bf16.msra.mxu1 %v1488_v25 }
 0x121   :  { %1315 = vmatprep.subr.bf16.mxu0 %v1489_v26  ;;  %1337 = vmatprep.subr.bf16.mxu1 %v1490_v27 }
 0x124   :  { %1316 = vmatpush3.bf16.msra.mxu0 %v1491_v28  ;;  %1338 = vmatpush3.bf16.msra.mxu1 %v1492_v29 }
 0x125   :  { %1317 = vmatprep.subr.bf16.mxu0 %v1493_v30  ;;  %1339 = vmatprep.subr.bf16.mxu1 %v1494_v31 }
 0x128   :  { %1318 = vmatpush3.bf16.msra.mxu0 %v1495_v32  ;;  %1340 = vmatpush3.bf16.msra.mxu1 %v1496_v33 }
 0x129   :  { %1319 = vmatprep.subr.bf16.mxu0 %v1497_v34  ;;  %1341 = vmatprep.subr.bf16.mxu1 %v1498_v37 }
 0x12c   :  { %1320 = vmatpush3.bf16.msra.mxu0 %v1499_v39  ;;  %1342 = vmatpush3.bf16.msra.mxu1 %v1500_v40 }
 0x12f   :  { %1088 = vmatmul.mubr.bf16.vlgmr.msra.gmra.mrb[12].mxu0 %v1667_v0  ;;  %1128 = vmatmul.mubr.bf16.vlgmr.msra.gmra.mrb[12].mxu1 %v1665_v59  ;;  %v1167_v59 = vrot.slane %v1158_v52, %v1659_v38 }
 0x1e2   :  { %v1007_v42 = vpop.f32.mrb[8].mxu0  ;;  %v1048_v43 = vpop.f32.mrb[8].mxu1 }
 0x1e3   :  { %v1008_v44 = vadd.f32 %v1007_v42, %v1669_v3  ;;  %v1009_v46 = vpop.f32.mrb[9].mxu0  ;;  %v1050_v47 = vpop.f32.mrb[9].mxu1 }
 0x1e4   :  { %v1010_v48 = vadd.f32 %v1009_v46, %v1675_v5  ;;  %v1011_v50 = vpop.f32.mrb[10].mxu0  ;;  %v1052_v51 = vpop.f32.mrb[10].mxu1 }
 0x1e5   :  { %v1049_v53 = vadd.f32 %v1048_v43, %v1008_v44  ;;  %v1012_v54 = vpop.f32.mrb[11].mxu0  ;;  %v1053_v55 = vpop.f32.mrb[11].mxu1 }
 0x1e6   :  { %v1051_v7 = vadd.f32 %v1050_v47, %v1010_v48 }
 0x1e7   :  { %v1152_v56 = vadd.f32 %v1140_v45, %v1049_v53 }
 0x1e8   :  { %v1153_v58 = vadd.f32 %v1144_v49, %v1051_v7 }
 0x1e9   :  { %v1155_v60 = vmax.f32 %v1152_v56, 0.0 }
 0x1ea   :  { %v1156_v61 = vmax.f32 %v1153_v58, 0.0 }
 0x1eb   :  { %v1175_v62 = vmul.f32 %v1163_v57, %v1155_v60 }
 0x1ec   :  { %v1176_v63 = vmul.f32 %v1167_v59, %v1156_v61 }
 0x1ee   :  { %v1178_v0 = vadd.f32 %v1176_v63, %v1175_v62 }
 0x202   :  { %v1321_v1 = vpop.f32.mrb[12].mxu0  ;;  %v1343_v2 = vpop.f32.mrb[12].mxu1 }
 0x203   :  { %v1322_v3 = vpop.f32.mrb[13].mxu0  ;;  %v1344_v5 = vpop.f32.mrb[13].mxu1 }
 0x204   :  { %v1323_v6 = vadd.f32 %v1322_v3, %v1321_v1  ;;  %v1345_v8 = vadd.f32 %v1344_v5, %v1343_v2  ;;  %v1324_v9 = vpop.f32.mrb[14].mxu0  ;;  %v1346_v10 = vpop.f32.mrb[14].mxu1 }
 0x205   :  { %v1325_v11 = vpop.f32.mrb[15].mxu0  ;;  %v1347_v12 = vpop.f32.mrb[15].mxu1 }
 0x206   :  { %v1090_v35 = vadd.f32 %v1323_v6, %v1671_v4 }
 0x208   :  { %v1130_v38 = vadd.f32 %v1345_v8, %v1090_v35 }
 0x20a   :  { %v1154_v14 = vadd.f32 %v1148_v13, %v1130_v38 }
 0x20c   :  { %v1157_v16 = vmax.f32 %v1154_v14, 0.0 }
 0x20e   :  { %v1177_v17 = vmul.f32 %v1171_v15, %v1157_v16 }
 0x210   :  { %v1179_v18 = vadd.f32 %v1178_v0, %v1177_v17 }
 0x212   :  { %1180 = vadd.xlane.f32.xlu0 %v1179_v18 }
 0x29f   :  { %v1181_v20 = vpop.xlane.xlu0 %1180 }
 0x2a0   :  { %v1189_v21 = vadd.f32 %v1302_v19, %v1181_v20 }
 0x2a2   :  { %1191 = vst.msk [vmem:[%s1706_s9] sm:$0xff] %vm1190_vm7, %v1189_v21 }
 0x2a3   :  { %1196 = vsyncpa [#allocation4], 1 }
 0x2a4   :  { %1197 = vsyncpa [#allocation6], 1 }

</bundles_post_ra>
